<compile_context>
chip_gen: v7x
topology: tpu7x:2x2x1
jax: 0.10.0
libtpu: 0.0.40
codegen_flags: <defaults>
</compile_context>

<pallas_src>
import math

import numpy as np
import jax
import jax.numpy as jnp
from jax.experimental import pallas as pl
from jax.experimental.pallas import tpu as pltpu


def _bbox_forward_kernel(x_ref, box_min_ref, inv_size_ref, o_ref):
    # (TILE_M, C) - (1, C) broadcast subtract, then a single broadcast multiply.
    o_ref[...] = (x_ref[...] - box_min_ref[...]) * inv_size_ref[...]


def bbox_forward(x, box_min, box_size, *, tile_rows=1024):
    """Apply (x - box_min) / box_size along the last axis via a Pallas kernel.

    x:        (..., dims) float
    box_min:  (dims,)
    box_size: (dims,)
    """
    dims = x.shape[-1]
    assert box_min.shape == (dims,) and box_size.shape == (dims,)

    orig_shape = x.shape
    dtype = x.dtype

    # Lane-dense width: smallest common multiple of `dims` and the 128-lane vreg.
    lane_width = (128 * dims) // math.gcd(128, dims)  # dims=3 -> 384

    box_min = box_min.astype(dtype)
    inv_box_size = (1.0 / box_size).astype(dtype)  # reciprocal precomputed in wrapper

    total = math.prod(orig_shape)
    flat = x.reshape(-1)

    pad = (-total) % lane_width
    if pad:
        # Only needed when the flat element count isn't a multiple of 384.
        # TODO(synk): split off the (<384-elem) tail into a scalar epilogue to
        # avoid this whole-array XLA pad copy for non-divisible sizes.
        flat = jnp.pad(flat, (0, pad))
    m = (total + pad) // lane_width
    x2d = flat.reshape(m, lane_width)

    # Tile the per-dimension box params across the lane-dense row; column c of
    # x2d always holds last-axis index (c % dims), independent of the row.
    reps = lane_width // dims
    bmin_row = jnp.tile(box_min, reps).reshape(1, lane_width)
    binv_row = jnp.tile(inv_box_size, reps).reshape(1, lane_width)

    # Block: (tile_rows, 384) f32 = 1.5 MiB. If the slab is shorter than one
    # tile, use the full row extent (allowed by the (8,128) rule).
    tr = tile_rows if m >= tile_rows else m
    grid = (pl.cdiv(m, tr),)  # non-dividing final block handled by Pallas masking

    out = pl.pallas_call(
        _bbox_forward_kernel,
        out_shape=jax.ShapeDtypeStruct((m, lane_width), dtype),
        grid_spec=pltpu.PrefetchScalarGridSpec(
            num_scalar_prefetch=0,
            grid=grid,
            in_specs=[
                pl.BlockSpec((tr, lane_width), lambda i: (i, 0)),
                pl.BlockSpec((1, lane_width), lambda i: (0, 0)),
                pl.BlockSpec((1, lane_width), lambda i: (0, 0)),
            ],
            out_specs=pl.BlockSpec((tr, lane_width), lambda i: (i, 0)),
        ),
        compiler_params=pltpu.CompilerParams(
            dimension_semantics=("parallel",),
        ),
    )(x2d, bmin_row, binv_row)

    flat_out = out.reshape(-1)
    if pad:
        flat_out = flat_out[:total]
    return flat_out.reshape(orig_shape)


def make_bbox_params(box_min_val, box_max_val, dims=3):
    """Deterministic parameter setup mirroring BBox.__init__ (box_min/box_max path)."""
    bmin = np.broadcast_to(np.asarray(box_min_val, np.float32), (dims,))
    bmax = np.broadcast_to(np.asarray(box_max_val, np.float32), (dims,))
    box_size = bmax - bmin
    box_center = (bmax + bmin) / 2.0
    box_min_out = box_center - box_size / 2.0
    assert (box_size > 0).all()  # host-side numpy check, no device sync
    return jnp.asarray(box_min_out), jnp.asarray(box_size)


if __name__ == "__main__":
    key = jax.random.PRNGKey(0)
    dims = 3

    # Deterministic box: BBox(box_min=-1, box_max=1) per dimension.
    box_min, box_size = make_bbox_params(-1.0, 1.0, dims=dims)

    test_shapes = [
        (2, 64, dims),   # 384 elements: exact lane-dense reshape, no pad
        (2, 8, dims),    # 48 elements: exercises the small / padded-tail path
        (128, 96, dims), # 36864 elements: multi-row lane-dense slab
    ]

    for i, shape in enumerate(test_shapes):
        k = jax.random.fold_in(key, i)
        x = jax.random.uniform(k, shape, dtype=jnp.float32, minval=-2.0, maxval=2.0)

        out = bbox_forward(x, box_min, box_size)
        out = jax.block_until_ready(out)

        # Reference check in plain JAX.
        ref = (x - box_min) / box_size
        assert out.shape == x.shape
        assert jnp.allclose(out, ref, atol=1e-5, rtol=1e-5), f"mismatch at shape {shape}"

    print("KERNEL_OK")
</pallas_src>

<mosaic_0001>
module attributes {stable_mosaic.version = 11 : i64} {
  func.func @_bbox_forward_kernel(%arg0: i32, %arg1: memref<1x384xf32, #tpu.memory_space<vmem>>, %arg2: memref<1x384xf32, #tpu.memory_space<vmem>>, %arg3: memref<1x384xf32, #tpu.memory_space<vmem>>, %arg4: memref<1x384xf32, #tpu.memory_space<vmem>>) attributes {dimension_semantics = [#tpu.dimension_semantics<parallel>], iteration_bounds = array<i64: 1>, scalar_prefetch = 0 : i64, scratch_operands = 0 : i64, tpu.core_type = #tpu.core_type<tc>, window_params = [{transform_indices = @transform_0, window_bounds = array<i64: 1, 384>}, {pipeline_mode = #tpu.pipeline_mode<synchronous>, transform_indices = @transform_1, window_bounds = array<i64: 1, 384>}, {pipeline_mode = #tpu.pipeline_mode<synchronous>, transform_indices = @transform_2, window_bounds = array<i64: 1, 384>}, {transform_indices = @transform_3, window_bounds = array<i64: 1, 384>}]} {
    %c0 = arith.constant 0 : index
    %c0_0 = arith.constant 0 : index
    %0 = vector.load %arg1[%c0, %c0_0] : memref<1x384xf32, #tpu.memory_space<vmem>>, vector<1x384xf32>
    %c0_1 = arith.constant 0 : index
    %c0_2 = arith.constant 0 : index
    %1 = vector.load %arg2[%c0_1, %c0_2] : memref<1x384xf32, #tpu.memory_space<vmem>>, vector<1x384xf32>
    %2 = arith.subf %0, %1 : vector<1x384xf32>
    %c0_3 = arith.constant 0 : index
    %c0_4 = arith.constant 0 : index
    %3 = vector.load %arg3[%c0_3, %c0_4] : memref<1x384xf32, #tpu.memory_space<vmem>>, vector<1x384xf32>
    %4 = arith.mulf %2, %3 : vector<1x384xf32>
    %c0_5 = arith.constant 0 : index
    %c0_6 = arith.constant 0 : index
    %5 = vector.load %arg4[%c0_5, %c0_6] : memref<1x384xf32, #tpu.memory_space<vmem>>, vector<1x384xf32>
    tpu.vector_store %arg4[%c0_5, %c0_6], %4 {strides = array<i32>} : memref<1x384xf32, #tpu.memory_space<vmem>>, vector<1x384xf32>,
    return
  }
  func.func @transform_0(%arg0: i32) -> (i32, i32) {
    %c0_i32 = arith.constant 0 : i32
    %c0_i32_0 = arith.constant 0 : i32
    return %arg0, %c0_i32 : i32, i32
  }
  func.func @transform_1(%arg0: i32) -> (i32, i32) {
    %c0_i32 = arith.constant 0 : i32
    %c0_i32_0 = arith.constant 0 : i32
    %c0_i32_1 = arith.constant 0 : i32
    return %c0_i32, %c0_i32_0 : i32, i32
  }
  func.func @transform_2(%arg0: i32) -> (i32, i32) {
    %c0_i32 = arith.constant 0 : i32
    %c0_i32_0 = arith.constant 0 : i32
    %c0_i32_1 = arith.constant 0 : i32
    return %c0_i32, %c0_i32_0 : i32, i32
  }
  func.func @transform_3(%arg0: i32) -> (i32, i32) {
    %c0_i32 = arith.constant 0 : i32
    %c0_i32_0 = arith.constant 0 : i32
    return %arg0, %c0_i32 : i32, i32
  }
}

</mosaic_0001>

<bundles_post_ra>
// kernel: tpu_custom_call.1
= control target key start
LH: loop header
LB: loop body
LE: loop exit
PB: predicated region body
PF: predicated region fallthrough
CT: control target
= control target key end

     0   :  { %8 = vsyncpa [#allocation3], 0  ;;  %s154_s0 = inlined_call_operand.hbm [shape: f32[1,384], index: 0, kind: input, shape index: {}]   ;;  %s155_s1 = inlined_call_operand.vmem [shape: f32[1,384], index: 1, kind: input, shape index: {}]   ;;  %s156_s2 = inlined_call_operand.vmem [shape: f32[1,384], index: 2, kind: input, shape index: {}]   ;;  %s157_s3 = inlined_call_operand.hbm [shape: f32[1,384], index: 3, kind: output, shape index: {}]  }
   0x1   :  { %9 = vsyncpa [#allocation4], 0  ;;  %s102_s12 = smov [#allocation2]   ;;  %s54_s16 = scalar_lea.hbm %s154_s0, 48 }
   0x2   :  { %s16_s13 = sshll.u32 %s102_s12, 4  ;;  %p55_p0 = scmp.ne.s32.totalorder %s154_s0, %s54_s16  ;;  %s17_s13 = int_to_ptr.vmem [resolvable:$true] %s16_s13 }
   0x3   :  { %p58_p1 = scmp.lt.u32.totalorder %s54_s16, %s154_s0 }
   0x5   :  { %p60_p2 = pnand %p58_p1, %p55_p0 }
   0x7   :  { %63 = shalt.err (!%p60_p2)
}
   0x8   :  { %s64_s21 = scalar_lea.vmem %s17_s13, 48  ;;  %s68_s22 = scalar_lea.vmem %s17_s13, 64 }
   0x9   :  { %p65_p3 = scmp.ne.s32.totalorder %s17_s13, %s64_s21  ;;  %p69_p4 = scmp.lt.s32.totalorder %s17_s13, %s17_s13 }
   0xa   :  { %p70_p5 = scmp.lt.s32.totalorder %s68_s22, %s64_s21 }
   0xc   :  { %p71_p6 = por %p70_p5, %p69_p4 }
   0xe   :  { %p72_p7 = pnand %p71_p6, %p65_p3 }
  0x10   :  { %75 = shalt.err (!%p72_p7)
}
  0x11   :  { %19 = dma.hbm_to_vmem [thread:$0]  %s154_s0, 48, %s17_s13, [#allocation3]  }
  0x12   :  { %98 = dma.done.wait [#allocation3], 48  }
  0x13   :  { %99 = vsyncadd [#allocation3], 4294967248  ;;  %v32_v0 = vlaneseq  ;;  %s103_s25 = smov [#allocation5]   ;;  %v27_v1 = vld [vmem:[#allocation2] sm:$0x7] }
  0x14   :  { %s43_s26 = sshll.u32 %s103_s25, 4  ;;  %v28_v2 = vld [vmem:[%s155_s1] sm:$0x7]  ;;  %s44_s26 = int_to_ptr.vmem [resolvable:$true] %s43_s26 }
  0x15   :  { %v30_v3 = vld [vmem:[%s156_s2] sm:$0x7]  ;;  %v29_v4 = vsub.f32 %v27_v1, %v28_v2  ;;  %vm34_vm0 = vcmp.lt.s32.totalorder %v32_v0, 384  ;;  %s76_s0 = scalar_lea.vmem %s44_s26, 48  ;;  %s80_s4 = scalar_lea.vmem %s44_s26, 64 }
  0x16   :  { %p77_p8 = scmp.ne.s32.totalorder %s44_s26, %s76_s0  ;;  %p81_p9 = scmp.lt.s32.totalorder %s44_s26, %s44_s26 }
  0x17   :  { %v31_v5 = vmul.f32 %v30_v3, %v29_v4  ;;  %p82_p10 = scmp.lt.s32.totalorder %s80_s4, %s76_s0 }
  0x19   :  { %36 = vst.msk [vmem:[#allocation5] sm:$0x7] %vm34_vm0, %v31_v5  ;;  %p83_p11 = por %p82_p10, %p81_p9 }
  0x1b   :  { %p84_p12 = pnand %p83_p11, %p77_p8 }
  0x1d   :  { %87 = shalt.err (!%p84_p12)
}
  0x1e   :  { %s88_s1 = scalar_lea.hbm %s157_s3, 48 }
  0x1f   :  { %p89_p13 = scmp.ne.s32.totalorder %s157_s3, %s88_s1  ;;  %p92_p0 = scmp.lt.u32.totalorder %s88_s1, %s157_s3 }
  0x21   :  { %p94_p1 = pnand %p92_p0, %p89_p13 }
  0x23   :  { %97 = shalt.err (!%p94_p1)
}
  0x24   :  { %46 = dma.vmem_to_hbm [thread:$0]  %s44_s26, 48, %s157_s3, [#allocation4]  }
  0x25   :  { %100 = dma.done.wait [#allocation4], 48  }
  0x26   :  { %101 = vsyncadd [#allocation4], 4294967248 }
  0x27   :  { %50 = vsyncpa [#allocation3], 1 }
  0x28   :  { %51 = vsyncpa [#allocation4], 1 }

</bundles_post_ra>
